<compile_context>
chip_gen: v5e
topology: v5e:2x2
jax: 0.10.0
libtpu: 0.0.40
codegen_flags: <defaults>
</compile_context>

<pallas_src>
import functools

import jax
import jax.numpy as jnp
from jax.experimental import pallas as pl
from jax.experimental.pallas import tpu as pltpu


def _default_vmem_limit_bytes():
  """Generation-aware scoped-VMEM budget.

  ~48 MiB on 128 MiB parts (v5e/v6e), ~40 MiB on 64 MiB parts (v7x); falls
  back conservatively if the hardware query is unavailable.
  """
  cap = None
  try:
    info = pltpu.get_tpu_info()
    cap = getattr(info, "vmem_capacity_bytes", None)
  except Exception:
    cap = None
  if cap is None:
    cap = 64 * 1024 * 1024          # assume the smaller (v7x-like) VMEM
  if cap >= 96 * 1024 * 1024:
    return 48 * 1024 * 1024
  return min(40 * 1024 * 1024, (5 * cap) // 8)


# ---------------------------------------------------------------------------
# Pass 1: QKV projection, computed ONCE per token (not per q-tile).
# Grid: (batch, seq_tiles, heads) with heads innermost so the x tile is
# DMA'd once and reused for every head.  Outputs are head-major
# (b, heads, n, dim_head) so the flash kernel needs no per-step relayout.
# Softmax scale is folded into w_q on the host, so Q comes out pre-scaled.
# ---------------------------------------------------------------------------
def _qkv_projection_kernel(x_ref, wq_ref, wk_ref, wv_ref,   # inputs
                           q_ref, k_ref, v_ref):            # outputs
  h = pl.program_id(2)
  xb = x_ref[0]                                   # (tn, dim), compute dtype
  q_ref[0, 0] = jnp.dot(xb, wq_ref[h],
                        preferred_element_type=jnp.float32).astype(q_ref.dtype)
  k_ref[0, 0] = jnp.dot(xb, wk_ref[h],
                        preferred_element_type=jnp.float32).astype(k_ref.dtype)
  v_ref[0, 0] = jnp.dot(xb, wv_ref[h],
                        preferred_element_type=jnp.float32).astype(v_ref.dtype)


# ---------------------------------------------------------------------------
# Pass 2: flash attention (online softmax) + fused output projection.
# Grid: (batch, q_tiles, kv_tiles); kv is the sequential reduction axis.
# Q block index is constant across kv, so it stays resident in VMEM.
# ---------------------------------------------------------------------------
def _flash_attention_kernel(q_ref, k_ref, v_ref, wout_ref, bout_ref,  # inputs
                            o_ref,                                    # output
                            m_sc, l_sc, acc_sc,                       # scratch
                            *, heads, compute_dtype):
  ki = pl.program_id(2)

  @pl.when(ki == 0)
  def _init():
    m_sc[...] = jnp.full(m_sc.shape, -jnp.inf, dtype=jnp.float32)
    l_sc[...] = jnp.zeros(l_sc.shape, dtype=jnp.float32)
    acc_sc[...] = jnp.zeros(acc_sc.shape, dtype=jnp.float32)

  q = q_ref[0]                                    # (heads, tq,  d) compute dt
  k = k_ref[0]                                    # (heads, tkv, d)
  v = v_ref[0]                                    # (heads, tkv, d)

  # Batched-over-heads scores; no explicit K transpose (contract last dims).
  s = jnp.einsum('hqd,hkd->hqk', q, k,
                 preferred_element_type=jnp.float32)      # (heads, tq, tkv)

  # Online softmax update (all statistics kept in f32).
  m_prev = m_sc[...]
  m_new = jnp.maximum(m_prev, jnp.max(s, axis=-1, keepdims=True))
  alpha = jnp.exp(m_prev - m_new)
  p = jnp.exp(s - m_new)                                   # (heads, tq, tkv)
  l_sc[...] = alpha * l_sc[...] + jnp.sum(p, axis=-1, keepdims=True)
  acc_sc[...] = alpha * acc_sc[...] + jnp.einsum(
      'hqk,hkd->hqd', p.astype(compute_dtype), v,
      preferred_element_type=jnp.float32)
  m_sc[...] = m_new

  # Finalize: exact normalization + fused output projection (+bias).
  @pl.when(ki == pl.num_programs(2) - 1)
  def _finalize():
    out_h = (acc_sc[...] * pl.reciprocal(l_sc[...], approx=False)
             ).astype(compute_dtype)                       # (heads, tq, d)
    tq = out_h.shape[1]
    dim = o_ref.shape[-1]
    acc = jnp.zeros((tq, dim), dtype=jnp.float32)
    # Per-head (tq,d)@(d,dim) matmuls (w_out pre-split into head row blocks):
    # avoids any head-concat relayout; runs once per q-tile only.
    for h in range(heads):
      acc = acc + jnp.dot(out_h[h], wout_ref[h],
                          preferred_element_type=jnp.float32)
    o_ref[0] = (acc + bout_ref[...]).astype(o_ref.dtype)


def attention_forward(x, w_qkv, w_out, b_out, *, heads, dim_head,
                      q_block=256, kv_block=256, proj_block=256,
                      compute_dtype=jnp.bfloat16,
                      vmem_limit_bytes=None):
  b, n, dim = x.shape
  inner = heads * dim_head
  assert w_qkv.shape == (dim, 3 * inner)
  assert w_out.shape == (inner, dim)
  scale = dim_head ** -0.5

  tq = min(q_block, n)
  tkv = min(kv_block, n)
  tn = min(proj_block, n)
  if n % tq or n % tkv or n % tn:
    raise ValueError(f"seq len {n} must be divisible by tiles ({tq},{tkv},{tn})")

  if vmem_limit_bytes is None:
    vmem_limit_bytes = _default_vmem_limit_bytes()

  out_dtype = x.dtype

  # ----- host-side weight prep (one-time, free relative to the kernels) -----
  w_q = w_qkv[:, 0 * inner:1 * inner] * scale   # fold softmax scale into w_q
  w_k = w_qkv[:, 1 * inner:2 * inner]
  w_v = w_qkv[:, 2 * inner:3 * inner]

  def per_head_cols(w):   # (dim, inner) -> (heads, dim, dim_head), compute dt
    return jnp.transpose(w.reshape(dim, heads, dim_head),
                         (1, 0, 2)).astype(compute_dtype)

  wq_h = per_head_cols(w_q)
  wk_h = per_head_cols(w_k)
  wv_h = per_head_cols(w_v)
  wout_h = w_out.reshape(heads, dim_head, dim).astype(compute_dtype)
  b_out2 = b_out.reshape(1, dim).astype(jnp.float32)
  x_c = x.astype(compute_dtype)

  # ------------- pass 1: QKV projection (once per token) --------------------
  qkv_shape = jax.ShapeDtypeStruct((b, heads, n, dim_head), compute_dtype)
  q_hm, k_hm, v_hm = pl.pallas_call(
      _qkv_projection_kernel,
      out_shape=(qkv_shape, qkv_shape, qkv_shape),
      grid_spec=pltpu.PrefetchScalarGridSpec(
          num_scalar_prefetch=0,
          grid=(b, n // tn, heads),
          in_specs=[
              pl.BlockSpec((1, tn, dim), lambda bi, ni, hi: (bi, ni, 0)),
              pl.BlockSpec((heads, dim, dim_head), lambda bi, ni, hi: (0, 0, 0)),
              pl.BlockSpec((heads, dim, dim_head), lambda bi, ni, hi: (0, 0, 0)),
              pl.BlockSpec((heads, dim, dim_head), lambda bi, ni, hi: (0, 0, 0)),
          ],
          out_specs=[
              pl.BlockSpec((1, 1, tn, dim_head),
                           lambda bi, ni, hi: (bi, hi, ni, 0)),
              pl.BlockSpec((1, 1, tn, dim_head),
                           lambda bi, ni, hi: (bi, hi, ni, 0)),
              pl.BlockSpec((1, 1, tn, dim_head),
                           lambda bi, ni, hi: (bi, hi, ni, 0)),
          ],
      ),
      compiler_params=pltpu.CompilerParams(
          dimension_semantics=("parallel", "parallel", "arbitrary"),
          vmem_limit_bytes=vmem_limit_bytes,
      ),
  )(x_c, wq_h, wk_h, wv_h)

  # ------------- pass 2: flash attention + output projection ----------------
  kernel = functools.partial(_flash_attention_kernel, heads=heads,
                             compute_dtype=compute_dtype)
  return pl.pallas_call(
      kernel,
      out_shape=jax.ShapeDtypeStruct((b, n, dim), out_dtype),
      grid_spec=pltpu.PrefetchScalarGridSpec(
          num_scalar_prefetch=0,
          grid=(b, n // tq, n // tkv),
          in_specs=[
              pl.BlockSpec((1, heads, tq, dim_head),
                           lambda bi, qi, ki: (bi, 0, qi, 0)),   # Q (resident)
              pl.BlockSpec((1, heads, tkv, dim_head),
                           lambda bi, qi, ki: (bi, 0, ki, 0)),   # K stream
              pl.BlockSpec((1, heads, tkv, dim_head),
                           lambda bi, qi, ki: (bi, 0, ki, 0)),   # V stream
              pl.BlockSpec((heads, dim_head, dim),
                           lambda bi, qi, ki: (0, 0, 0)),        # w_out
              pl.BlockSpec((1, dim), lambda bi, qi, ki: (0, 0)), # b_out
          ],
          out_specs=pl.BlockSpec((1, tq, dim), lambda bi, qi, ki: (bi, qi, 0)),
          scratch_shapes=[
              pltpu.VMEM((heads, tq, 1), jnp.float32),         # running max
              pltpu.VMEM((heads, tq, 1), jnp.float32),         # running denom
              pltpu.VMEM((heads, tq, dim_head), jnp.float32),  # output accum
          ],
      ),
      compiler_params=pltpu.CompilerParams(
          dimension_semantics=("parallel", "parallel", "arbitrary"),
          vmem_limit_bytes=vmem_limit_bytes,
      ),
  )(q_hm, k_hm, v_hm, wout_h, b_out2)


def attention_reference(x, w_qkv, w_out, b_out, *, heads, dim_head):
  # Pure-JAX reference mirroring the PyTorch forward (mask=None, dropout=0).
  b, n, dim = x.shape
  inner = heads * dim_head
  scale = dim_head ** -0.5
  qkv = jnp.einsum("bnd,df->bnf", x, w_qkv)
  q, k, v = jnp.split(qkv, 3, axis=-1)

  def split_heads(t):
    return t.reshape(b, n, heads, dim_head).transpose(0, 2, 1, 3)

  q, k, v = map(split_heads, (q, k, v))
  dots = jnp.einsum("bhid,bhjd->bhij", q, k) * scale
  attn = jax.nn.softmax(dots, axis=-1)
  out = jnp.einsum("bhij,bhjd->bhid", attn, v)
  out = out.transpose(0, 2, 1, 3).reshape(b, n, inner)
  return jnp.einsum("bnf,fd->bnd", out, w_out) + b_out


if __name__ == "__main__":
  # Small, deterministic configuration; seq=16 with 8-row tiles so the
  # multi-kv-tile online-softmax path (flash grid = (2, 2, 2)) is exercised.
  batch, seq, dim = 2, 16, 32
  heads, dim_head = 4, 16
  inner = heads * dim_head

  key = jax.random.PRNGKey(0)
  kx, kqkv, kwo, kbo = jax.random.split(key, 4)

  x = jax.random.normal(kx, (batch, seq, dim), dtype=jnp.float32)
  w_qkv = jax.random.uniform(kqkv, (dim, 3 * inner), jnp.float32,
                             minval=-1.0, maxval=1.0) / (dim ** 0.5)
  w_out = jax.random.uniform(kwo, (inner, dim), jnp.float32,
                             minval=-1.0, maxval=1.0) / (inner ** 0.5)
  b_out = jax.random.uniform(kbo, (dim,), jnp.float32,
                             minval=-1.0, maxval=1.0) / (inner ** 0.5)

  ref = attention_reference(x, w_qkv, w_out, b_out,
                            heads=heads, dim_head=dim_head)

  # f32-operand path (tight numerical check).
  out_f32 = attention_forward(x, w_qkv, w_out, b_out,
                              heads=heads, dim_head=dim_head,
                              q_block=8, kv_block=8, proj_block=8,
                              compute_dtype=jnp.float32)
  out_f32 = jax.block_until_ready(out_f32)
  assert out_f32.shape == (batch, seq, dim)
  assert jnp.allclose(out_f32, ref, atol=1e-3, rtol=1e-3), (
      float(jnp.max(jnp.abs(out_f32 - ref))))

  # Default bf16 MXU-operand path (f32 accumulation / f32 softmax state).
  out_bf16 = attention_forward(x, w_qkv, w_out, b_out,
                               heads=heads, dim_head=dim_head,
                               q_block=8, kv_block=8, proj_block=8)
  out_bf16 = jax.block_until_ready(out_bf16)
  assert out_bf16.shape == (batch, seq, dim)
  assert jnp.allclose(out_bf16, ref, atol=3e-2, rtol=3e-2), (
      float(jnp.max(jnp.abs(out_bf16 - ref))))

  print("KERNEL_OK")
</pallas_src>

<mosaic_0001>
module attributes {stable_mosaic.version = 11 : i64} {
  func.func @_qkv_projection_kernel(%arg0: i32, %arg1: i32, %arg2: i32, %arg3: memref<1x8x32xf32, #tpu.memory_space<vmem>>, %arg4: memref<4x32x16xf32, #tpu.memory_space<vmem>>, %arg5: memref<4x32x16xf32, #tpu.memory_space<vmem>>, %arg6: memref<4x32x16xf32, #tpu.memory_space<vmem>>, %arg7: memref<1x1x8x16xf32, #tpu.memory_space<vmem>>, %arg8: memref<1x1x8x16xf32, #tpu.memory_space<vmem>>, %arg9: memref<1x1x8x16xf32, #tpu.memory_space<vmem>>) attributes {dimension_semantics = [#tpu.dimension_semantics<parallel>, #tpu.dimension_semantics<parallel>, #tpu.dimension_semantics<arbitrary>], iteration_bounds = array<i64: 2, 2, 4>, scalar_prefetch = 0 : i64, scratch_operands = 0 : i64, tpu.core_type = #tpu.core_type<tc>, window_params = [{transform_indices = @transform_0, window_bounds = array<i64: 1, 8, 32>}, {pipeline_mode = #tpu.pipeline_mode<synchronous>, transform_indices = @transform_1, window_bounds = array<i64: 4, 32, 16>}, {pipeline_mode = #tpu.pipeline_mode<synchronous>, transform_indices = @transform_2, window_bounds = array<i64: 4, 32, 16>}, {pipeline_mode = #tpu.pipeline_mode<synchronous>, transform_indices = @transform_3, window_bounds = array<i64: 4, 32, 16>}, {transform_indices = @transform_4, window_bounds = array<i64: 1, 1, 8, 16>}, {transform_indices = @transform_5, window_bounds = array<i64: 1, 1, 8, 16>}, {transform_indices = @transform_6, window_bounds = array<i64: 1, 1, 8, 16>}]} {
    %c0 = arith.constant 0 : index
    %c0_0 = arith.constant 0 : index
    %c0_1 = arith.constant 0 : index
    %0 = vector.load %arg3[%c0, %c0_0, %c0_1] : memref<1x8x32xf32, #tpu.memory_space<vmem>>, vector<1x8x32xf32>
    %1 = vector.shape_cast %0 : vector<1x8x32xf32> to vector<8x32xf32>
    %2 = arith.index_cast %arg2 : i32 to index
    %c0_2 = arith.constant 0 : index
    %c0_3 = arith.constant 0 : index
    %3 = vector.load %arg4[%2, %c0_2, %c0_3] : memref<4x32x16xf32, #tpu.memory_space<vmem>>, vector<1x32x16xf32>
    %4 = vector.shape_cast %3 : vector<1x32x16xf32> to vector<32x16xf32>
    %cst = arith.constant dense<0.000000e+00> : vector<8x16xf32>
    %5 = tpu.matmul %1, %4, %cst {dimension_numbers = #tpu.dot_dimension_numbers<[1], [0], [0], [1], [0, 0, 1, 1], [], []>} : vector<8x32xf32>, vector<32x16xf32>, vector<8x16xf32> -> vector<8x16xf32>
    %c0_4 = arith.constant 0 : index
    %c0_5 = arith.constant 0 : index
    %c0_6 = arith.constant 0 : index
    %c0_7 = arith.constant 0 : index
    %6 = vector.load %arg7[%c0_4, %c0_5, %c0_6, %c0_7] : memref<1x1x8x16xf32, #tpu.memory_space<vmem>>, vector<1x1x8x16xf32>
    %7 = vector.shape_cast %6 : vector<1x1x8x16xf32> to vector<8x16xf32>
    %8 = vector.shape_cast %5 : vector<8x16xf32> to vector<1x1x8x16xf32>
    tpu.vector_store %arg7[%c0_4, %c0_5, %c0_6, %c0_7], %8 {strides = array<i32>} : memref<1x1x8x16xf32, #tpu.memory_space<vmem>>, vector<1x1x8x16xf32>,
    %9 = arith.index_cast %arg2 : i32 to index
    %c0_8 = arith.constant 0 : index
    %c0_9 = arith.constant 0 : index
    %10 = vector.load %arg5[%9, %c0_8, %c0_9] : memref<4x32x16xf32, #tpu.memory_space<vmem>>, vector<1x32x16xf32>
    %11 = vector.shape_cast %10 : vector<1x32x16xf32> to vector<32x16xf32>
    %cst_10 = arith.constant dense<0.000000e+00> : vector<8x16xf32>
    %12 = tpu.matmul %1, %11, %cst_10 {dimension_numbers = #tpu.dot_dimension_numbers<[1], [0], [0], [1], [0, 0, 1, 1], [], []>} : vector<8x32xf32>, vector<32x16xf32>, vector<8x16xf32> -> vector<8x16xf32>
    %c0_11 = arith.constant 0 : index
    %c0_12 = arith.constant 0 : index
    %c0_13 = arith.constant 0 : index
    %c0_14 = arith.constant 0 : index
    %13 = vector.load %arg8[%c0_11, %c0_12, %c0_13, %c0_14] : memref<1x1x8x16xf32, #tpu.memory_space<vmem>>, vector<1x1x8x16xf32>
    %14 = vector.shape_cast %13 : vector<1x1x8x16xf32> to vector<8x16xf32>
    %15 = vector.shape_cast %12 : vector<8x16xf32> to vector<1x1x8x16xf32>
    tpu.vector_store %arg8[%c0_11, %c0_12, %c0_13, %c0_14], %15 {strides = array<i32>} : memref<1x1x8x16xf32, #tpu.memory_space<vmem>>, vector<1x1x8x16xf32>,
    %16 = arith.index_cast %arg2 : i32 to index
    %c0_15 = arith.constant 0 : index
    %c0_16 = arith.constant 0 : index
    %17 = vector.load %arg6[%16, %c0_15, %c0_16] : memref<4x32x16xf32, #tpu.memory_space<vmem>>, vector<1x32x16xf32>
    %18 = vector.shape_cast %17 : vector<1x32x16xf32> to vector<32x16xf32>
    %cst_17 = arith.constant dense<0.000000e+00> : vector<8x16xf32>
    %19 = tpu.matmul %1, %18, %cst_17 {dimension_numbers = #tpu.dot_dimension_numbers<[1], [0], [0], [1], [0, 0, 1, 1], [], []>} : vector<8x32xf32>, vector<32x16xf32>, vector<8x16xf32> -> vector<8x16xf32>
    %c0_18 = arith.constant 0 : index
    %c0_19 = arith.constant 0 : index
    %c0_20 = arith.constant 0 : index
    %c0_21 = arith.constant 0 : index
    %20 = vector.load %arg9[%c0_18, %c0_19, %c0_20, %c0_21] : memref<1x1x8x16xf32, #tpu.memory_space<vmem>>, vector<1x1x8x16xf32>
    %21 = vector.shape_cast %20 : vector<1x1x8x16xf32> to vector<8x16xf32>
    %22 = vector.shape_cast %19 : vector<8x16xf32> to vector<1x1x8x16xf32>
    tpu.vector_store %arg9[%c0_18, %c0_19, %c0_20, %c0_21], %22 {strides = array<i32>} : memref<1x1x8x16xf32, #tpu.memory_space<vmem>>, vector<1x1x8x16xf32>,
    return
  }
  func.func @transform_0(%arg0: i32, %arg1: i32, %arg2: i32) -> (i32, i32, i32) {
    %c0_i32 = arith.constant 0 : i32
    %c0_i32_0 = arith.constant 0 : i32
    return %arg0, %arg1, %c0_i32 : i32, i32, i32
  }
  func.func @transform_1(%arg0: i32, %arg1: i32, %arg2: i32) -> (i32, i32, i32) {
    %c0_i32 = arith.constant 0 : i32
    %c0_i32_0 = arith.constant 0 : i32
    %c0_i32_1 = arith.constant 0 : i32
    %c0_i32_2 = arith.constant 0 : i32
    return %c0_i32, %c0_i32_0, %c0_i32_1 : i32, i32, i32
  }
  func.func @transform_2(%arg0: i32, %arg1: i32, %arg2: i32) -> (i32, i32, i32) {
    %c0_i32 = arith.constant 0 : i32
    %c0_i32_0 = arith.constant 0 : i32
    %c0_i32_1 = arith.constant 0 : i32
    %c0_i32_2 = arith.constant 0 : i32
    return %c0_i32, %c0_i32_0, %c0_i32_1 : i32, i32, i32
  }
  func.func @transform_3(%arg0: i32, %arg1: i32, %arg2: i32) -> (i32, i32, i32) {
    %c0_i32 = arith.constant 0 : i32
    %c0_i32_0 = arith.constant 0 : i32
    %c0_i32_1 = arith.constant 0 : i32
    %c0_i32_2 = arith.constant 0 : i32
    return %c0_i32, %c0_i32_0, %c0_i32_1 : i32, i32, i32
  }
  func.func @transform_4(%arg0: i32, %arg1: i32, %arg2: i32) -> (i32, i32, i32, i32) {
    %c0_i32 = arith.constant 0 : i32
    %c0_i32_0 = arith.constant 0 : i32
    return %arg0, %arg2, %arg1, %c0_i32 : i32, i32, i32, i32
  }
  func.func @transform_5(%arg0: i32, %arg1: i32, %arg2: i32) -> (i32, i32, i32, i32) {
    %c0_i32 = arith.constant 0 : i32
    %c0_i32_0 = arith.constant 0 : i32
    return %arg0, %arg2, %arg1, %c0_i32 : i32, i32, i32, i32
  }
  func.func @transform_6(%arg0: i32, %arg1: i32, %arg2: i32) -> (i32, i32, i32, i32) {
    %c0_i32 = arith.constant 0 : i32
    %c0_i32_0 = arith.constant 0 : i32
    return %arg0, %arg2, %arg1, %c0_i32 : i32, i32, i32, i32
  }
}

</mosaic_0001>

<bundles_post_ra>
// kernel: tpu_custom_call.1
= control target key start
LH: loop header
LB: loop body
LE: loop exit
PB: predicated region body
PF: predicated region fallthrough
CT: control target
= control target key end

     0   :  { %s1192_s0 = inlined_call_operand.vmem [shape: f32[2,16,32], index: 0, kind: input, shape index: {}]   ;;  %s1193_s1 = inlined_call_operand.vmem [shape: f32[4,32,16], index: 1, kind: input, shape index: {}]   ;;  %s1194_s2 = inlined_call_operand.vmem [shape: f32[4,32,16], index: 2, kind: input, shape index: {}]   ;;  %s1195_s3 = inlined_call_operand.vmem [shape: f32[4,32,16], index: 3, kind: input, shape index: {}]   ;;  %s1196_s4 = inlined_call_operand.hbm [shape: f32[2,4,16,16], index: 4, kind: output, shape index: {0}]   ;;  %s1197_s5 = inlined_call_operand.hbm [shape: f32[2,4,16,16], index: 5, kind: output, shape index: {1}]   ;;  %s1198_s6 = inlined_call_operand.hbm [shape: f32[2,4,16,16], index: 6, kind: output, shape index: {2}]  }
   0x1   :  { %1210 = sst [smem:[#allocation15_spill]] %s1192_s0 }
   0x2   :  { %1211 = sst [smem:[#allocation16_spill]] %s1193_s1 }
   0x3   :  { %1212 = sst [smem:[#allocation17_spill]] %s1194_s2 }
   0x4   :  { %12 = vsyncpa [#allocation3], 0 }
   0x5   :  { %14 = vsyncpa [#allocation3 + $0x1], 0 }
   0x6   :  { %15 = vsyncpa [#allocation5], 0 }
   0x7   :  { %17 = vsyncpa [#allocation5 + $0x1], 0  ;;  %s956_s21 = smov 0   ;;  %s958_s22 = smov 0  }
   0x8   :  { %s960_s23 = smov 0   ;;  %s962_s24 = smov 0  }
   0x9   :  { %s964_s25 = smov 0   ;;  %s966_s26 = smov 0  }
   0xa   :  { %s968_s27 = smov 0   ;;  %s970_s28 = smov 0  }
   0xb   :  { %s972_s29 = smov 0   ;;  %s974_s30 = smov 0  }
   0xc LB: > { %1213 = sst [smem:[#allocation9_spill]] %s911_s28  ;;  %s1200_s7 = sadd.s32 4294967295, %s919_s30   ;;  %s919_s30 = sphi %s974_s30, %s23_s30   ;;  %s915_s29 = sphi %s972_s29, %s1243_s29   ;;  %s911_s28 = sphi %s970_s28, %s1235_s28   ;;  %s907_s27 = sphi %s968_s27, %s1242_s27   ;;  %s903_s26 = sphi %s966_s26, %s1241_s26   ;;  %s899_s25 = sphi %s964_s25, %s1233_s25   ;;  %s895_s24 = sphi %s962_s24, %s1240_s24   ;;  %s891_s23 = sphi %s960_s23, %s1239_s23   ;;  %s887_s22 = sphi %s958_s22, %s1238_s22   ;;  %s883_s21 = sphi %s956_s21, %s1237_s21  }
   0xd   : > { %s35_s8 = sadd.s32 1, %s907_s27  ;;  %s38_s9 = sadd.s32 1, %s911_s28 }
   0xe   : > { %p36_p0 = scmp.ge.s32.totalorder %s35_s8, 4  ;;  %s1199_s10 = sadd.s32 4294967294, %s919_s30  }
   0xf   : > { %p154_p1 = scmp.ne.s32.totalorder %s891_s23, %s887_s22  ;;  %s42_s11 = sadd.s32 1, %s915_s29 }
  0x10   : > { %s1245_s8 = smov (%p36_p0, %s35_s8), 0  ;;  %s1247_s9 = smov (!%p36_p0, %s38_s9), %s911_s28 }
  0x11   : > { %1214 = sst [smem:[#allocation10_spill]] %s1245_s8  ;;  %p155_p2 = scmp.eq.s32.totalorder %s1200_s7, 15 }
  0x12   : > { %p40_p3 = scmp.ge.s32.totalorder %s1247_s9, 2  ;;  %p160_p4 = scmp.ne.s32.totalorder %s887_s22, %s883_s21 }
  0x13   : > { %p1020_p5 = por %p155_p2, %p154_p1  ;;  %p161_p6 = scmp.eq.s32.totalorder %s1199_s10, 15 }
  0x14   : > { %s1249_s9 = smov (%p40_p3, %s1247_s9), 0  ;;  %s1251_s11 = smov (!%p40_p3, %s42_s11), %s915_s29 }
  0x15   : > { %1216 = sst [smem:[#allocation11_spill]] %s1249_s9  ;;  %p1029_p7 = por %p161_p6, %p160_p4 }
  0x16   : > { %p44_p8 = scmp.ge.s32.totalorder %s1251_s11, 2  ;;  %p628_p9 = scmp.ge.s32.totalorder %s919_s30, 1 }
  0x17   : > { %s138_s14 = ssub.s32 %s907_s27, %s1245_s8  ;;  %p259_p10 = scmp.lt.s32.totalorder %s919_s30, 17 }
  0x18   : > { %s1253_s11 = smov (%p44_p8, %s1251_s11), 0  ;;  %s140_s15 = ssub.s32 %s911_s28, %s1249_s9 }
  0x19   : > { %1218 = sst [smem:[#allocation12_spill]] %s1253_s11  ;;  %p260_p11 = pnand %p628_p9, %p259_p10 }
  0x1a   : > { %s137_s16 = ssub.s32 %s915_s29, %s1253_s11  ;;  %s144_s19 = sadd.s32 1, %s891_s23 }
  0x1b   : > { %s139_s17 = sor.u32 %s138_s14, %s137_s16  ;;  %263 = sbr.rel (%p260_p11) target bundleno = 214 (0xd6), region = 36 }
  0x1c   : > { %s141_s18 = sor.u32 %s140_s15, %s139_s17 }
  0x1d   : > { %p142_p12 = scmp.eq.s32.totalorder %s141_s18, 0 }
  0x1f   : > { %s1045_s20 = scalar_select %p142_p12, %s891_s23, %s144_s19  }
  0x20   : > { %s634_s10 = sshll.u32 %s895_s24, 5  ;;  %p302_p13 = scmp.lt.s32.totalorder %s903_s26, 1  ;;  %vm317_vm0 = vcmask 261120   ;;  %vm341_vm1 = vcmask 130048  }
  0x21   : > { %s369_s9 = scalar_lea.vmem %s1195_s3, %s634_s10  ;;  %s1219_s2 = sld [smem:[#allocation17_spill]] }
  0x22   : > { %v373_v0 = vld [vmem:[%s369_s9 + $0x18] sm:$0xff]  ;;  %v372_v1 = vld [vmem:[%s369_s9 + $0x10] sm:$0xff]  ;;  %s1220_s1 = sld [smem:[#allocation16_spill]]  ;;  %p304_p0 = scmp.lt.s32.totalorder %s899_s25, 1  ;;  %v371_v4 = vld [vmem:[%s369_s9 + $0x8] sm:$0xff] }
  0x23   : > { %386 = vmatpush.msra.mxu2 %v373_v0  ;;  %s303_s18 = scalar_select %p302_p13, %s903_s26, 1  ;;  %v370_v9 = vld [vmem:[%s369_s9] sm:$0xff] }
  0x24   : > { %s305_s7 = scalar_select %p304_p0, %s899_s25, 1 }
  0x25   : > { %387 = vmatpush.msra.mxu2 %v372_v1  ;;  %s632_s28 = sshll.u32 %s303_s18, 1  ;;  %s1221_s0 = sld [smem:[#allocation15_spill]] }
  0x26   : > { %s307_s8 = sadd.s32 %s632_s28, %s305_s7  ;;  %s641_s9 = sshll.u32 %s895_s24, 1 }
  0x27   : > { %s343_s14 = scalar_lea.vmem %s1219_s2, %s634_s10  ;;  %388 = vmatpush.msra.mxu2 %v371_v4  ;;  %s416_s16 = sadd.s32 %s899_s25, %s641_s9 }
  0x28   : > { %s312_s17 = scalar_lea.vmem %s1220_s1, %s634_s10  ;;  %v347_v2 = vld [vmem:[%s343_s14 + $0x18] sm:$0xff]  ;;  %v346_v5 = vld [vmem:[%s343_s14 + $0x10] sm:$0xff]  ;;  %v345_v7 = vld [vmem:[%s343_s14 + $0x8] sm:$0xff]  ;;  %s633_s10 = sshll.u32 %s307_s8, 3 }
  0x29   : > { %v316_v3 = vld [vmem:[%s312_s17 + $0x18] sm:$0xff]  ;;  %360 = vmatpush.msra.mxu1 %v347_v2  ;;  %v315_v6 = vld [vmem:[%s312_s17 + $0x10] sm:$0xff]  ;;  %v314_v8 = vld [vmem:[%s312_s17 + $0x8] sm:$0xff]  ;;  %389 = vmatpush.msra.mxu2 %v370_v9  ;;  %s642_s18 = sshll.u32 %s903_s26, 3 }
  0x2a   : > { %333 = vmatpush.msra.mxu0 %v316_v3  ;;  %v344_v10 = vld [vmem:[%s343_s14] sm:$0xff]  ;;  %s1205_s14 = sand.u32 1, %s887_s22   ;;  %s418_s7 = sadd.s32 %s642_s18, %s416_s16 }
  0x2b   : > { %361 = vmatpush.msra.mxu1 %v346_v5  ;;  %s309_s15 = scalar_lea.vmem %s1221_s0, %s633_s10  ;;  %v313_v11 = vld [vmem:[%s312_s17] sm:$0xff]  ;;  %s1070_s28 = sshll.u32 %s1205_s14, 3 }
  0x2c   : > { %334 = vmatpush.msra.mxu0 %v315_v6  ;;  %v310_v12 = vld [vmem:[%s309_s15] sm:$0xff]  ;;  %s643_s8 = sshll.u32 %s418_s7, 3  ;;  %s1222_s10 = sadd.s32 4294967295, %s919_s30  }
  0x2d   : > { %362 = vmatpush.msra.mxu1 %v345_v7  ;;  %637 = vmatmul.msk.f32.vlgmr.msra.gmra.mxu2 %vm317_vm0, %v310_v12  ;;  %s1074_s17 = sand.u32 1, %s1222_s10   ;;  %s438_s15 = scalar_lea.hbm %s1197_s5, %s643_s8 }
  0x2e   : > { %335 = vmatpush.msra.mxu0 %v314_v8  ;;  %s420_s24 = scalar_lea.hbm %s1196_s4, %s643_s8  ;;  %s294_s25 = scalar_lea.vmem [#allocation4], %s1070_s28 }
  0x2f   : > { %363 = vmatpush.msra.mxu1 %v344_v10  ;;  %s1083_s26 = sshll.u32 %s294_s25, 4  ;;  %s1085_s9 = sshll.u32 %s438_s15, 4  ;;  %s441_s26 = int_to_ptr.vmem [resolvable:$true] %s1083_s26  ;;  %s443_s9 = int_to_ptr.hbm [resolvable:$true] %s1085_s9 }
  0x30   : > { %336 = vmatpush.msra.mxu0 %v313_v11  ;;  %636 = vmatmul.msk.f32.vlgmr.msra.gmra.mxu1 %vm317_vm0, %v310_v12  ;;  %s287_s16 = scalar_lea.vmem [#allocation2], %s1070_s28  ;;  %s1090_s7 = sshll.u32 %s420_s24, 4 }
  0x31   : > { %635 = vmatmul.msk.f32.vlgmr.msra.gmra.mxu0 %vm317_vm0, %v310_v12  ;;  %s1088_s18 = sshll.u32 %s287_s16, 4  ;;  %1224 = sst [smem:[#allocation14_spill]] %s1090_s7 }
  0x32   : > { %1223 = sst [smem:[#allocation13_spill]] %s1088_s18  ;;  %s456_s10 = scalar_lea.hbm %s1198_s6, %s643_s8 }
  0x33   : > { %s1209_s11 = scalar_lea.vmem [#allocation6], %s1070_s28  ;;  %s1105_s15 = sshll.u32 %s456_s10, 4  ;;  %s461_s15 = int_to_ptr.hbm [resolvable:$true] %s1105_s15 }
  0x34   : > { %s1103_s19 = sshll.u32 %s1209_s11, 4  ;;  %s401_s24 = scalar_lea.sflag [#allocation5], %s1074_s17  ;;  %s459_s19 = int_to_ptr.vmem [resolvable:$true] %s1103_s19 }
  0x35   : > { %s763_s14 = sshra.s32 %s443_s9, 4  ;;  %s764_s14 = int_to_ptr.hbm [resolvable:$true] %s763_s14 }
  0x36   : > { %s765_s8 = scalar_lea.hbm %s764_s14, 8  ;;  %p770_p4 = scmp.lt.s32.totalorder %s764_s14, %s1197_s5 }
  0x37   : > { %p766_p1 = scmp.ne.s32.totalorder %s764_s14, %s765_s8 }
  0x39   : > { %p767_p2 = pnand %p766_p1, %p1020_p5 }
  0x3b   : > { %p768_p3 = pneg %p767_p2 }
  0xad   : > { %v365_v13 = vpop.f32.mrf.mxu1 }
  0xae   : > { %368 = vst.msk [vmem:[%s294_s25] sm:$0xff] %vm341_vm1, %v365_v13  ;;  %v338_v14 = vpop.f32.mrf.mxu0  ;;  %s769_s25 = scalar_lea.hbm %s1197_s5, 128 }
  0xaf   : > { %342 = vst.msk [vmem:[%s287_s16] sm:$0xff] %vm341_vm1, %v338_v14  ;;  %p771_p6 = scmp.lt.s32.totalorder %s769_s25, %s765_s8 }
  0xb1   : > { %p772_p8 = por %p771_p6, %p770_p4 }
  0xb3   : > { %p773_p9 = pnand %p772_p8, %p768_p3 }
  0xb5   : > { %776 = shalt.err (!%p773_p9)
}
  0xb6   : > { %s1225_s16 = sld [smem:[#allocation14_spill]]  ;;  %s1226_s10 = sand.u32 1, %s887_s22  }
  0xb7   : > { %653 = dma.vmem_to_hbm [thread:$0]  (%p1020_p5), %s441_s26, 128, %s443_s9, %s401_s24  }
  0xb8   : > { %s396_s11 = scalar_lea.sflag [#allocation3], %s1226_s10  ;;  %s797_s7 = scalar_lea.hbm %s1196_s4, 128 }
  0xbc   : > { %s1227_s0 = int_to_ptr.hbm [resolvable:$true] %s1225_s16 }
  0xbd   : > { %s791_s1 = sshra.s32 %s1227_s0, 4  ;;  %s792_s1 = int_to_ptr.hbm [resolvable:$true] %s791_s1 }
  0xbe   : > { %s793_s2 = scalar_lea.hbm %s792_s1, 8  ;;  %p798_p13 = scmp.lt.s32.totalorder %s792_s1, %s1196_s4 }
  0xbf   : > { %p794_p10 = scmp.ne.s32.totalorder %s792_s1, %s793_s2  ;;  %p799_p0 = scmp.lt.s32.totalorder %s797_s7, %s793_s2 }
  0xc1   : > { %p795_p11 = pnand %p794_p10, %p1020_p5  ;;  %p800_p1 = por %p799_p0, %p798_p13 }
  0xc3   : > { %p796_p12 = pneg %p795_p11 }
  0xc5   : > { %p801_p2 = pnand %p800_p1, %p796_p12 }
  0xc7   : > { %804 = shalt.err (!%p801_p2)
}
  0xc8   : > { %s1228_s26 = smov %s1227_s0  ;;  %s1229_s9 = sld [smem:[#allocation13_spill]]  ;;  %v391_v15 = vpop.f32.mrf.mxu2 }
  0xc9   : > { %s1231_s0 = scalar_lea.vmem [#allocation6], %s1070_s28  ;;  %s819_s2 = sshra.s32 %s461_s15, 4  ;;  %s820_s2 = int_to_ptr.hbm [resolvable:$true] %s819_s2 }
  0xca   : > { %394 = vst.msk [vmem:[%s1231_s0] sm:$0xff] %vm341_vm1, %v391_v15  ;;  %s821_s1 = scalar_lea.hbm %s820_s2, 8  ;;  %s825_s18 = scalar_lea.hbm %s1198_s6, 128 }
  0xcb   : > { %p822_p3 = scmp.ne.s32.totalorder %s820_s2, %s821_s1  ;;  %p826_p8 = scmp.lt.s32.totalorder %s820_s2, %s1198_s6 }
  0xcc   : > { %p827_p9 = scmp.lt.s32.totalorder %s825_s18, %s821_s1 }
  0xcd   : > { %p823_p4 = pnand %p822_p3, %p1020_p5 }
  0xce   : > { %s1230_s10 = int_to_ptr.vmem [resolvable:$true] %s1229_s9  ;;  %p828_p10 = por %p827_p9, %p826_p8 }
  0xcf   : > { %652 = dma.vmem_to_hbm [thread:$0]  (%p1020_p5), %s1230_s10, 128, %s1228_s26, %s396_s11  }
  0xd0   : > { %p824_p6 = pneg %p823_p4 }
  0xd2   : > { %p829_p11 = pnand %p828_p10, %p824_p6 }
  0xd4   : > { %832 = shalt.err (!%p829_p11)
}
  0xd5   : > { %654 = dma.vmem_to_hbm [thread:$0]  (%p1020_p5), %s459_s19, 128, %s461_s15, %s401_s24  }
  0xd6 PF: > { %p668_p12 = scmp.ge.s32.totalorder %s919_s30, 2  ;;  %s472_s28 = sand.u32 1, %s883_s21  }
  0xd7   : > { %s473_s11 = scalar_lea.sflag [#allocation3], %s472_s28 }
  0xd8   : > { %p659_p13 = pnand %p668_p12, %p1029_p7 }
  0xda   : > { %p660_p0 = pneg %p659_p13 }
  0xdc   : > { %874 = dma.done.wait (%p660_p0), %s473_s11, 128  }
  0xdd   : > { %876 = vsyncadd (%p660_p0), %s473_s11, 4294967168  ;;  %s1232_s25 = sadd.s32 4294967294, %s919_s30  }
  0xde   : > { %s482_s26 = sand.u32 1, %s1232_s25  }
  0xdf   : > { %s483_s9 = scalar_lea.sflag [#allocation5], %s482_s26 }
  0xe0   : > { %878 = dma.done.wait (%p660_p0), %s483_s9, 256  }
  0xe1   : > { %880 = vsyncadd (%p660_p0), %s483_s9, 4294967040  ;;  %s23_s30 = sadd.s32 1, %s919_s30   ;;  %s1233_s25 = sld [smem:[#allocation9_spill]] }
  0xe2   : > { %p20_p5 = scmp.ge.s32.totalorder %s23_s30, 18   ;;  %s1234_s12 = sld [smem:[#allocation10_spill]] }
  0xe3   : > { %s1235_s28 = sld [smem:[#allocation11_spill]]  ;;  %s1237_s21 = smov %s887_s22 }
  0xe4   : > { %s1236_s13 = sld [smem:[#allocation12_spill]]  ;;  %s1238_s22 = smov %s891_s23 }
  0xe5   : > { %s1239_s23 = smov %s1045_s20  ;;  %s1240_s24 = smov %s907_s27 }
  0xe6   : > { %s1241_s26 = smov %s915_s29  ;;  %22 = sbr.rel (!%p20_p5) target bundleno = 12 (0xc), region = 106 }
  0xe8   : > { %s1242_s27 = smov %s1234_s12 }
  0xea   : > { %s1243_s29 = smov %s1236_s13 }
  0xeb   :  { %499 = vsyncpa [#allocation3], 1 }
  0xec   :  { %501 = vsyncpa [#allocation3 + $0x1], 1 }
  0xed   :  { %502 = vsyncpa [#allocation5], 1 }
  0xee   :  { %504 = vsyncpa [#allocation5 + $0x1], 1 }

</bundles_post_ra>
